<compile_context>
chip_gen: v7x
topology: tpu7x:2x2x1
jax: 0.10.0
libtpu: 0.0.40
codegen_flags: <defaults>
</compile_context>

<pallas_src>
import math

import jax
import jax.numpy as jnp
from jax import lax
from jax.experimental import pallas as pl
from jax.experimental.pallas import tpu as pltpu


def make_deeponet_kernel(depth: int, activation=jnp.tanh):
    """Kernel closure for a DeepONet whose branch/trunk MLPs have `depth` linear layers.

    Ref order:
      x_branch, x_trunk,
      Wb0 (bf16), bb0 (f32), Wt0 (f32 if n_trunk==1 else bf16), bt0 (f32),
      Wf_1 (bf16), bf_1 (f32), ..., Wf_{depth-2}, bf_{depth-2},   # block-diag hidden layers
      Wbl_pad (bf16), bbl (f32), Wtl_pad (bf16), btl (f32),       # zero-padded final layers
      bias (SMEM, (1, 1)),
      out                                                          # [B, T_pad] (lane dense)
    """
    n_hidden = depth - 2

    def kernel(xb_ref, xt_ref, *rest):
        out_ref = rest[-1]
        bias_ref = rest[-2]
        wrefs = rest[:-2]

        xb = xb_ref[...]
        xt = xt_ref[...]
        B = xb.shape[0]
        T = xt.shape[0]

        # --- first layers (different input widths, kept separate) ---
        Wb0 = wrefs[0][...]
        bb0 = wrefs[1][...]
        Wt0 = wrefs[2][...]
        bt0 = wrefs[3][...]
        w = Wb0.shape[1]

        h_b = activation(
            jnp.dot(xb.astype(jnp.bfloat16), Wb0, preferred_element_type=jnp.float32) + bb0
        )
        if xt.shape[1] == 1:
            # K=1 contraction -> plain f32 VPU broadcast multiply (no MXU pass, no padding).
            h_t = activation(xt * Wt0 + bt0)
        else:
            h_t = activation(
                jnp.dot(xt.astype(jnp.bfloat16), Wt0, preferred_element_type=jnp.float32) + bt0
            )

        # --- stack branch/trunk activations into one [B+T, 2w] block, in registers ---
        # The explicit zero blocks are load-bearing: they keep the off-diagonal inputs of
        # the block-diagonal hidden layers exact (no stale-VMEM / NaN contamination).
        zb = jnp.zeros((B, w), jnp.float32)
        zt = jnp.zeros((T, w), jnp.float32)
        h = jnp.concatenate(
            [jnp.concatenate([h_b, zb], axis=1),
             jnp.concatenate([zt, h_t], axis=1)],
            axis=0,
        )  # [B+T, 2w]

        # --- fused hidden layers: ONE matmul / bias / tanh per layer instead of two ---
        # Off-diagonal columns pick up bias-only junk, but the block-diagonal weights keep
        # it isolated from the diagonal blocks, so the diagonal path stays exact.
        off = 4
        for i in range(n_hidden):
            Wf = wrefs[off + 2 * i][...]          # point-of-use load (bf16)
            bf = wrefs[off + 2 * i + 1][...]      # f32
            h = activation(
                jnp.dot(h.astype(jnp.bfloat16), Wf, preferred_element_type=jnp.float32) + bf
            )

        # --- final layers: zero-padded [2w, p] weights, full-row (lane-0) slices of h ---
        Wbl = wrefs[off + 2 * n_hidden][...]      # [2w, p] bf16, bottom half zero
        bbl = wrefs[off + 2 * n_hidden + 1][...]  # [1, p] f32
        Wtl = wrefs[off + 2 * n_hidden + 2][...]  # [2w, p] bf16, top half zero
        btl = wrefs[off + 2 * n_hidden + 3][...]  # [1, p] f32

        h_bf16 = h.astype(jnp.bfloat16)
        branch_out = (
            jnp.dot(h_bf16[0:B, :], Wbl, preferred_element_type=jnp.float32) + bbl
        )                                                         # [B, p]
        trunk_out = jnp.maximum(
            jnp.dot(h_bf16[B:, :], Wtl, preferred_element_type=jnp.float32) + btl, 0.0
        )                                                         # [T, p] (final_act=True)

        # Combine: contract the last dim of both operands (transposed-RHS matmul; no
        # explicit XLU transpose of trunk_out).
        combine = lax.dot_general(
            branch_out.astype(jnp.bfloat16),
            trunk_out.astype(jnp.bfloat16),
            dimension_numbers=(((1,), (1,)), ((), ())),
            preferred_element_type=jnp.float32,
        ) + bias_ref[0, 0]                                        # [B, T]

        # Lane-dense, unmasked store of the full [B, T_pad] tile.
        T_pad = out_ref.shape[1]
        if T_pad == T:
            out_ref[...] = combine
        else:
            out_ref[...] = jnp.concatenate(
                [combine, jnp.zeros((B, T_pad - T), jnp.float32)], axis=1
            )

    return kernel


def deeponet_forward(x_branch, x_trunk, first_branch, first_trunk, hidden_fused, final_padded,
                     bias):
    """Calls the Pallas kernel.  All fused / padded / bf16 weights are built ONCE by
    `fuse_deeponet_params` (no per-call padding or dtype conversion of parameters)."""
    depth = len(hidden_fused) + 2
    B = x_branch.shape[0]
    T = x_trunk.shape[0]
    T_pad = max(128, ((T + 127) // 128) * 128)   # lane-dense output tile

    flat_args = [
        x_branch, x_trunk,
        first_branch[0], first_branch[1],
        first_trunk[0], first_trunk[1],
    ]
    for W, b in hidden_fused:
        flat_args += [W, b]
    flat_args += list(final_padded)
    flat_args.append(bias.reshape(1, 1))

    vmem = pl.BlockSpec(memory_space=pltpu.MemorySpace.VMEM)
    in_specs = [vmem] * (len(flat_args) - 1) + [
        pl.BlockSpec(memory_space=pltpu.MemorySpace.SMEM)
    ]

    out = pl.pallas_call(
        make_deeponet_kernel(depth),
        out_shape=jax.ShapeDtypeStruct((B, T_pad), jnp.float32),
        in_specs=in_specs,
        out_specs=vmem,
    )(*flat_args)
    return out[:, :T]


# ----------------------------- parameter construction -----------------------------

def init_linear(key, fan_in, fan_out):
    """PyTorch nn.Linear default init: U(-1/sqrt(fan_in), 1/sqrt(fan_in)) for W and b.
    Weights stored [in, out] (transpose of PyTorch) so each layer is `x @ W + b`."""
    kw, kb = jax.random.split(key)
    bound = 1.0 / math.sqrt(fan_in)
    W = jax.random.uniform(kw, (fan_in, fan_out), jnp.float32, -bound, bound)
    b = jax.random.uniform(kb, (1, fan_out), jnp.float32, -bound, bound)
    return W, b


def init_mlp(key, input_size, hidden, out, depth):
    dims = [input_size] + [hidden] * (depth - 1) + [out]
    keys = jax.random.split(key, depth)
    return [init_linear(keys[i], dims[i], dims[i + 1]) for i in range(depth)]


def fuse_deeponet_params(branch_params, trunk_params):
    """Built once at init time: bf16 MXU weights, block-diagonal hidden layers, and
    zero-padded final layers, so the kernel never pads or rebuilds weights per call."""
    depth = len(branch_params)
    w = branch_params[0][0].shape[1]
    p = branch_params[-1][0].shape[1]
    n_trunk = trunk_params[0][0].shape[0]

    Wb0, bb0 = branch_params[0]
    Wt0, bt0 = trunk_params[0]
    first_branch = (Wb0.astype(jnp.bfloat16), bb0)
    # K=1 trunk first layer is a VPU broadcast-multiply; keep it f32 (v5e VPU has no bf16).
    first_trunk = ((Wt0 if n_trunk == 1 else Wt0.astype(jnp.bfloat16)), bt0)

    hidden_fused = []
    for i in range(1, depth - 1):
        Wb, bb = branch_params[i]
        Wt, bt = trunk_params[i]
        zb = jnp.zeros((Wb.shape[0], Wt.shape[1]), jnp.float32)
        zt = jnp.zeros((Wt.shape[0], Wb.shape[1]), jnp.float32)
        Wf = jnp.concatenate(
            [jnp.concatenate([Wb, zb], axis=1),
             jnp.concatenate([zt, Wt], axis=1)],
            axis=0,
        )                                   # [2w, 2w] block-diagonal
        bf = jnp.concatenate([bb, bt], axis=1)
        hidden_fused.append((Wf.astype(jnp.bfloat16), bf))

    # Final layer: zero-pad each half's weight to [2w, p] (NOT block-diagonal).  Each final
    # matmul then reads full rows of h (no lane-offset column slices); the zero half kills
    # the bias-induced junk in the off-diagonal columns of h, so the result stays exact.
    Wbl, bbl = branch_params[-1]
    Wtl, btl = trunk_params[-1]
    Wbl_pad = jnp.concatenate([Wbl, jnp.zeros((w, p), jnp.float32)], axis=0)   # [2w, p]
    Wtl_pad = jnp.concatenate([jnp.zeros((w, p), jnp.float32), Wtl], axis=0)   # [2w, p]
    final_padded = (Wbl_pad.astype(jnp.bfloat16), bbl, Wtl_pad.astype(jnp.bfloat16), btl)

    return first_branch, first_trunk, hidden_fused, final_padded


# --------------------------------- pure-JAX reference ---------------------------------

def reference_forward(x_branch, x_trunk, branch_params, trunk_params, bias):
    """Faithful f32 re-implementation of the PyTorch DeepONet forward."""
    def mlp(x, params, final_relu):
        for i, (W, b) in enumerate(params):
            x = x @ W + b
            if i < len(params) - 1:
                x = jnp.tanh(x)
        return jnp.maximum(x, 0.0) if final_relu else x

    bout = mlp(x_branch, branch_params, False)
    tout = mlp(x_trunk, trunk_params, True)
    return bout @ tout.T + bias[0]


if __name__ == "__main__":
    # DeepONet hyper-parameters (small, consistent with the module's constructor)
    n_branch, n_trunk = 16, 1
    width, depth, p = 32, 3, 16
    B, T = 8, 8  # batch of input functions, number of trunk evaluation points

    key = jax.random.PRNGKey(0)
    k_xb, k_xt, k_b, k_t = jax.random.split(key, 4)

    x_branch = jax.random.normal(k_xb, (B, n_branch), jnp.float32)
    x_trunk = jax.random.normal(k_xt, (T, n_trunk), jnp.float32)

    branch_params = init_mlp(k_b, n_branch, width, p, depth)
    trunk_params = init_mlp(k_t, n_trunk, width, p, depth)
    bias = jnp.ones((1,), jnp.float32)  # nn.Parameter(torch.ones((1,)))

    # Fuse / pad / cast weights once at init, not per forward call.
    first_branch, first_trunk, hidden_fused, final_padded = fuse_deeponet_params(
        branch_params, trunk_params
    )

    out = deeponet_forward(
        x_branch, x_trunk, first_branch, first_trunk, hidden_fused, final_padded, bias
    )
    out = jax.block_until_ready(out)

    ref = reference_forward(x_branch, x_trunk, branch_params, trunk_params, bias)
    assert out.shape == (B, T)
    # Tolerance reflects bf16 MXU inputs (weights + pre-dot activation casts) vs the pure
    # f32 reference; accumulation is f32 throughout.
    assert jnp.allclose(out, ref, atol=2e-2, rtol=2e-2), "mismatch vs pure-JAX reference"

    print("KERNEL_OK")
</pallas_src>

<mosaic_0001>
module attributes {stable_mosaic.version = 11 : i64} {
  func.func @kernel(%arg0: memref<8x16xf32, #tpu.memory_space<vmem>>, %arg1: memref<8x1xf32, #tpu.memory_space<vmem>>, %arg2: memref<16x32xbf16, #tpu.memory_space<vmem>>, %arg3: memref<1x32xf32, #tpu.memory_space<vmem>>, %arg4: memref<1x32xf32, #tpu.memory_space<vmem>>, %arg5: memref<1x32xf32, #tpu.memory_space<vmem>>, %arg6: memref<64x64xbf16, #tpu.memory_space<vmem>>, %arg7: memref<1x64xf32, #tpu.memory_space<vmem>>, %arg8: memref<64x16xbf16, #tpu.memory_space<vmem>>, %arg9: memref<1x16xf32, #tpu.memory_space<vmem>>, %arg10: memref<64x16xbf16, #tpu.memory_space<vmem>>, %arg11: memref<1x16xf32, #tpu.memory_space<vmem>>, %arg12: memref<1x1xf32, #tpu.memory_space<smem>>, %arg13: memref<8x128xf32, #tpu.memory_space<vmem>>) attributes {dimension_semantics = [], scalar_prefetch = 0 : i64, scratch_operands = 0 : i64, tpu.core_type = #tpu.core_type<tc>} {
    %c0 = arith.constant 0 : index
    %c0_0 = arith.constant 0 : index
    %0 = vector.load %arg0[%c0, %c0_0] : memref<8x16xf32, #tpu.memory_space<vmem>>, vector<8x16xf32>
    %c0_1 = arith.constant 0 : index
    %c0_2 = arith.constant 0 : index
    %1 = vector.load %arg1[%c0_1, %c0_2] : memref<8x1xf32, #tpu.memory_space<vmem>>, vector<8x1xf32>
    %c0_3 = arith.constant 0 : index
    %c0_4 = arith.constant 0 : index
    %2 = vector.load %arg2[%c0_3, %c0_4] : memref<16x32xbf16, #tpu.memory_space<vmem>>, vector<16x32xbf16>
    %c0_5 = arith.constant 0 : index
    %c0_6 = arith.constant 0 : index
    %3 = vector.load %arg3[%c0_5, %c0_6] : memref<1x32xf32, #tpu.memory_space<vmem>>, vector<1x32xf32>
    %c0_7 = arith.constant 0 : index
    %c0_8 = arith.constant 0 : index
    %4 = vector.load %arg4[%c0_7, %c0_8] : memref<1x32xf32, #tpu.memory_space<vmem>>, vector<1x32xf32>
    %c0_9 = arith.constant 0 : index
    %c0_10 = arith.constant 0 : index
    %5 = vector.load %arg5[%c0_9, %c0_10] : memref<1x32xf32, #tpu.memory_space<vmem>>, vector<1x32xf32>
    %6 = arith.truncf %0 : vector<8x16xf32> to vector<8x16xbf16>
    %cst = arith.constant dense<0.000000e+00> : vector<8x32xf32>
    %7 = tpu.matmul %6, %2, %cst {dimension_numbers = #tpu.dot_dimension_numbers<[1], [0], [0], [1], [0, 0, 1, 1], [], []>} : vector<8x16xbf16>, vector<16x32xbf16>, vector<8x32xf32> -> vector<8x32xf32>
    %8 = vector.broadcast %3 : vector<1x32xf32> to vector<8x32xf32>
    %9 = arith.addf %7, %8 : vector<8x32xf32>
    %10 = math.tanh %9 : vector<8x32xf32>
    %11 = vector.broadcast %1 : vector<8x1xf32> to vector<8x32xf32>
    %12 = vector.broadcast %4 : vector<1x32xf32> to vector<8x32xf32>
    %13 = arith.mulf %11, %12 : vector<8x32xf32>
    %14 = vector.broadcast %5 : vector<1x32xf32> to vector<8x32xf32>
    %15 = arith.addf %13, %14 : vector<8x32xf32>
    %16 = math.tanh %15 : vector<8x32xf32>
    %cst_11 = arith.constant 0.000000e+00 : f32
    %17 = vector.broadcast %cst_11 : f32 to vector<8x32xf32>
    %cst_12 = arith.constant 0.000000e+00 : f32
    %18 = vector.broadcast %cst_12 : f32 to vector<8x32xf32>
    %19 = tpu.concatenate %10, %17 in 1 : vector<8x32xf32>, vector<8x32xf32> -> vector<8x64xf32>
    %20 = tpu.concatenate %18, %16 in 1 : vector<8x32xf32>, vector<8x32xf32> -> vector<8x64xf32>
    %21 = tpu.concatenate %19, %20 in 0 : vector<8x64xf32>, vector<8x64xf32> -> vector<16x64xf32>
    %c0_13 = arith.constant 0 : index
    %c0_14 = arith.constant 0 : index
    %22 = vector.load %arg6[%c0_13, %c0_14] : memref<64x64xbf16, #tpu.memory_space<vmem>>, vector<64x64xbf16>
    %c0_15 = arith.constant 0 : index
    %c0_16 = arith.constant 0 : index
    %23 = vector.load %arg7[%c0_15, %c0_16] : memref<1x64xf32, #tpu.memory_space<vmem>>, vector<1x64xf32>
    %24 = arith.truncf %21 : vector<16x64xf32> to vector<16x64xbf16>
    %cst_17 = arith.constant dense<0.000000e+00> : vector<16x64xf32>
    %25 = tpu.matmul %24, %22, %cst_17 {dimension_numbers = #tpu.dot_dimension_numbers<[1], [0], [0], [1], [0, 0, 1, 1], [], []>} : vector<16x64xbf16>, vector<64x64xbf16>, vector<16x64xf32> -> vector<16x64xf32>
    %26 = vector.broadcast %23 : vector<1x64xf32> to vector<16x64xf32>
    %27 = arith.addf %25, %26 : vector<16x64xf32>
    %28 = math.tanh %27 : vector<16x64xf32>
    %c0_18 = arith.constant 0 : index
    %c0_19 = arith.constant 0 : index
    %29 = vector.load %arg8[%c0_18, %c0_19] : memref<64x16xbf16, #tpu.memory_space<vmem>>, vector<64x16xbf16>
    %c0_20 = arith.constant 0 : index
    %c0_21 = arith.constant 0 : index
    %30 = vector.load %arg9[%c0_20, %c0_21] : memref<1x16xf32, #tpu.memory_space<vmem>>, vector<1x16xf32>
    %c0_22 = arith.constant 0 : index
    %c0_23 = arith.constant 0 : index
    %31 = vector.load %arg10[%c0_22, %c0_23] : memref<64x16xbf16, #tpu.memory_space<vmem>>, vector<64x16xbf16>
    %c0_24 = arith.constant 0 : index
    %c0_25 = arith.constant 0 : index
    %32 = vector.load %arg11[%c0_24, %c0_25] : memref<1x16xf32, #tpu.memory_space<vmem>>, vector<1x16xf32>
    %33 = arith.truncf %28 : vector<16x64xf32> to vector<16x64xbf16>
    %34 = vector.extract_strided_slice %33 {offsets = [0, 0], sizes = [8, 64], strides = [1, 1]} : vector<16x64xbf16> to vector<8x64xbf16>
    %cst_26 = arith.constant dense<0.000000e+00> : vector<8x16xf32>
    %35 = tpu.matmul %34, %29, %cst_26 {dimension_numbers = #tpu.dot_dimension_numbers<[1], [0], [0], [1], [0, 0, 1, 1], [], []>} : vector<8x64xbf16>, vector<64x16xbf16>, vector<8x16xf32> -> vector<8x16xf32>
    %36 = vector.broadcast %30 : vector<1x16xf32> to vector<8x16xf32>
    %37 = arith.addf %35, %36 : vector<8x16xf32>
    %38 = vector.extract_strided_slice %33 {offsets = [8, 0], sizes = [8, 64], strides = [1, 1]} : vector<16x64xbf16> to vector<8x64xbf16>
    %cst_27 = arith.constant dense<0.000000e+00> : vector<8x16xf32>
    %39 = tpu.matmul %38, %31, %cst_27 {dimension_numbers = #tpu.dot_dimension_numbers<[1], [0], [0], [1], [0, 0, 1, 1], [], []>} : vector<8x64xbf16>, vector<64x16xbf16>, vector<8x16xf32> -> vector<8x16xf32>
    %40 = vector.broadcast %32 : vector<1x16xf32> to vector<8x16xf32>
    %41 = arith.addf %39, %40 : vector<8x16xf32>
    %cst_28 = arith.constant 0.000000e+00 : f32
    %42 = vector.broadcast %cst_28 : f32 to vector<8x16xf32>
    %43 = arith.maximumf %41, %42 : vector<8x16xf32>
    %44 = arith.truncf %37 : vector<8x16xf32> to vector<8x16xbf16>
    %45 = arith.truncf %43 : vector<8x16xf32> to vector<8x16xbf16>
    %cst_29 = arith.constant dense<0.000000e+00> : vector<8x8xf32>
    %46 = tpu.matmul %44, %45, %cst_29 {dimension_numbers = #tpu.dot_dimension_numbers<[1], [1], [0], [0], [0, 0, 1, 0], [], []>} : vector<8x16xbf16>, vector<8x16xbf16>, vector<8x8xf32> -> vector<8x8xf32>
    %c0_30 = arith.constant 0 : index
    %c0_31 = arith.constant 0 : index
    %47 = memref.load %arg12[%c0_30, %c0_31] : memref<1x1xf32, #tpu.memory_space<smem>>
    %48 = vector.broadcast %47 : f32 to vector<8x8xf32>
    %49 = arith.addf %46, %48 : vector<8x8xf32>
    %cst_32 = arith.constant 0.000000e+00 : f32
    %50 = vector.broadcast %cst_32 : f32 to vector<8x120xf32>
    %51 = tpu.concatenate %49, %50 in 1 : vector<8x8xf32>, vector<8x120xf32> -> vector<8x128xf32>
    %c0_33 = arith.constant 0 : index
    %c0_34 = arith.constant 0 : index
    %52 = vector.load %arg13[%c0_33, %c0_34] : memref<8x128xf32, #tpu.memory_space<vmem>>, vector<8x128xf32>
    tpu.vector_store %arg13[%c0_33, %c0_34], %51 {strides = array<i32>} : memref<8x128xf32, #tpu.memory_space<vmem>>, vector<8x128xf32>,
    return
  }
}

</mosaic_0001>

<bundles_post_ra>
// kernel: tpu_custom_call.1
= control target key start
LH: loop header
LB: loop body
LE: loop exit
PB: predicated region body
PF: predicated region fallthrough
CT: control target
= control target key end

     0   :  { %v603_v2 = vmov 0   ;;  %v604_v3 = vmov 0.0   ;;  %vm67_vm0 = vcmask 130048   ;;  %vm605_vm1 = vmmov 0   ;;  %s786_s0 = inlined_call_operand.vmem [shape: f32[8,16], index: 0, kind: input, shape index: {}]   ;;  %s787_s1 = inlined_call_operand.vmem [shape: f32[8,1], index: 1, kind: input, shape index: {}]   ;;  %s788_s2 = inlined_call_operand.vmem [shape: bf16[16,32], index: 2, kind: input, shape index: {}]   ;;  %s789_s3 = inlined_call_operand.vmem [shape: f32[1,32], index: 3, kind: input, shape index: {}]   ;;  %s790_s4 = inlined_call_operand.vmem [shape: f32[1,32], index: 4, kind: input, shape index: {}]   ;;  %s791_s5 = inlined_call_operand.vmem [shape: f32[1,32], index: 5, kind: input, shape index: {}]   ;;  %s792_s6 = inlined_call_operand.vmem [shape: bf16[64,64], index: 6, kind: input, shape index: {}]   ;;  %s793_s7 = inlined_call_operand.vmem [shape: f32[1,64], index: 7, kind: input, shape index: {}]   ;;  %s794_s8 = inlined_call_operand.vmem [shape: bf16[64,16], index: 8, kind: input, shape index: {}]   ;;  %s795_s9 = inlined_call_operand.vmem [shape: f32[1,16], index: 9, kind: input, shape index: {}]   ;;  %s796_s10 = inlined_call_operand.vmem [shape: bf16[64,16], index: 10, kind: input, shape index: {}]   ;;  %s797_s11 = inlined_call_operand.vmem [shape: f32[1,16], index: 11, kind: input, shape index: {}]   ;;  %s798_s12 = inlined_call_operand.<no memory space> [shape: f32[1,1], index: 12, kind: input, shape index: {}]   ;;  %s799_s13 = inlined_call_operand.hbm [shape: f32[8,128], index: 13, kind: output, shape index: {}]  }
   0x1   :  { %v48_v0 = vld [vmem:[%s787_s1] sm:$0xff]  ;;  %557 = vset.pattern.permute.xlu0 %v603_v2  ;;  %504 = vmatprep.subr.bf16.mxu0 %v604_v3 }
   0x2   :  { %v558_v1 = vld [vmem:[%s788_s2] sm:$0xff]   ;;  %114 = vperm.xlu0 %557, %v48_v0   ;;  %506 = vmatprep.mubr.msk.bf16.mxu0 %vm605_vm1, %v604_v3 }
   0x3   :  { %v47_v4 = vld [vmem:[%s786_s0] sm:$0xff]  ;;  %505 = vmatpush3.bf16.msra.mxu0 %v558_v1  ;;  %510 = vmatprep.subr.bf16.mxu1 %v604_v3 }
   0x4   :  { %v54_v5 = vpack.c.bf16 %v47_v4, %v47_v4  ;;  %518 = vmatprep.mubr.msk.bf16.mxu1 %vm605_vm1, %v604_v3  ;;  %522 = vmatprep.subr.bf16.mxu0 %v604_v3 }
   0x6   :  { %507 = vmatmul.mubr.msk.bf16.vlgmr.msra.gmra.mrb[0].mxu0 %vm67_vm0, %v54_v5 }
   0x7   :  { %530 = vmatprep.mubr.msk.bf16.mxu0 %vm605_vm1, %v604_v3 }
   0x8   :  { %19 = vsyncpa [#allocation4], 0  ;;  %v559_v6 = vld [vmem:[%s792_s6] sm:$0xff]   ;;  %v560_v7 = vld [vmem:[%s792_s6 + $0x8] sm:$0xff]   ;;  %s606_s23 = smov 32   ;;  %vm132_vm2 = vcmask 261120   ;;  %v397_v62 = vstv %s798_s12 }
   0x9   :  { %511 = vmatpush3.bf16.msra.mxu1 %v559_v6  ;;  %v561_v8 = vld [vmem:[%s792_s6 + $0x10] sm:$0xff]   ;;  %v464_v9 = vld [vmem:[%s790_s4] ss:$0 sm:$0xff]  ;;  %v562_v13 = vld [vmem:[%s792_s6 + $0x18] sm:$0xff]   ;;  %vm179_vm3 = vcmask 523264   ;;  %s607_s22 = smov [#allocation3]  }
   0xa   :  { %512 = vmatprep.subr.bf16.mxu1 %v604_v3  ;;  %v465_v10 = vld [vmem:[%s791_s5] ss:$0 sm:$0xff]  ;;  %v565_v29 = vld [vmem:[%s794_s8 + $0x8] sm:$0xff]   ;;  %v567_v31 = vld [vmem:[%s794_s8 + $0x10] sm:$0xff]   ;;  %vm444_vm4 = vcmask 64512  }
   0xb   :  { %v461_v20 = vld [vmem:[%s789_s3] ss:$0 sm:$0xff]  ;;  %v566_v30 = vld [vmem:[%s796_s10 + $0x8] sm:$0xff]   ;;  %v568_v32 = vld [vmem:[%s796_s10 + $0x10] sm:$0xff]  }
   0xc   :  { %v563_v27 = vld [vmem:[%s794_s8] sm:$0xff]   ;;  %v569_v33 = vld [vmem:[%s794_s8 + $0x18] sm:$0xff]  }
   0xd   :  { %513 = vmatpush3.bf16.msra.mxu1 %v560_v7  ;;  %523 = vmatpush3.bf16.msra.mxu0 %v563_v27  ;;  %v564_v28 = vld [vmem:[%s796_s10] sm:$0xff]   ;;  %v570_v34 = vld [vmem:[%s796_s10 + $0x18] sm:$0xff]  }
   0xe   :  { %514 = vmatprep.subr.bf16.mxu1 %v604_v3  ;;  %524 = vmatprep.subr.bf16.mxu0 %v604_v3  ;;  %v466_v35 = vld [vmem:[%s793_s7] ss:$0 sm:$0xff] }
   0xf   :  { %v478_v47 = vld [vmem:[%s797_s11] ss:$0 sm:$0xff] }
  0x10   :  { %v472_v58 = vld [vmem:[%s795_s9] ss:$0 sm:$0xff] }
  0x11   :  { %515 = vmatpush3.bf16.msra.mxu1 %v561_v8  ;;  %525 = vmatpush3.bf16.msra.mxu0 %v565_v29 }
  0x12   :  { %516 = vmatprep.subr.bf16.mxu1 %v604_v3  ;;  %526 = vmatprep.subr.bf16.mxu0 %v604_v3 }
  0x15   :  { %517 = vmatpush3.bf16.msra.mxu1 %v562_v13  ;;  %527 = vmatpush3.bf16.msra.mxu0 %v567_v31 }
  0x16   :  { %534 = vmatprep.subr.bf16.mxu1 %v604_v3  ;;  %528 = vmatprep.subr.bf16.mxu0 %v604_v3 }
  0x19   :  { %529 = vmatpush3.bf16.msra.mxu0 %v569_v33 }
  0x1a   :  { %546 = vmatprep.subr.bf16.mxu0 %v604_v3 }
  0x81   :  { %v115_v11 = vpop.permute.xlu0 %114 }
  0x82   :  { %v123_v12 = vmul.f32 %v464_v9, %v115_v11 }
  0x84   :  { %v130_v14 = vadd.f32 %v465_v10, %v123_v12 }
  0x86   :  { %571 = vtanh.f32 %v130_v14 }
  0x90   :  { %v572_v15 = vpop.eup %571 }
  0x91   :  { %135 = vrot.lane.b32.xlu0 %v572_v15, %s606_s23  ;;  %s453_s23 = sshll.u32 %s607_s22, 4  ;;  %s454_s23 = int_to_ptr.vmem [resolvable:$true] %s453_s23 }
  0x92   :  { %s579_s9 = scalar_lea.vmem %s454_s23, 128  ;;  %p584_p1 = scmp.lt.s32.totalorder %s454_s23, %s454_s23 }
  0x93   :  { %p580_p0 = scmp.ne.s32.totalorder %s454_s23, %s579_s9  ;;  %p585_p2 = scmp.lt.s32.totalorder %s579_s9, %s579_s9 }
  0x95   :  { %p586_p3 = por %p585_p2, %p584_p1 }
  0x97   :  { %p587_p4 = pnand %p586_p3, %p580_p0 }
  0xd9   :  { %v105_v16 = vpop.f32.mrb[0].mxu0 }
  0xda   :  { %v508_v17 = vpop.f32.mrb[1].mxu0  ;;  %v106_v21 = vadd.f32 %v461_v20, %v105_v16 }
  0xdb   :  { %v108_v18 = vpop.f32.mrb[2].mxu0 }
  0xdc   :  { %v509_v19 = vpop.f32.mrb[3].mxu0  ;;  %573 = vtanh.f32 %v106_v21 }
  0xe6   :  { %v574_v22 = vpop.eup %573 }
  0xe7   :  { %v133_v23 = vsel %vm132_vm2, %v574_v22, 0.0 }
 0x103   :  { %v136_v24 = vpop.permute.xlu0 %135 }
 0x104   :  { %v138_v25 = vsel %vm132_vm2, 0.0, %v136_v24 }
 0x105   :  { %v148_v26 = vpack.c.bf16 %v138_v25, %v133_v23 }
 0x107   :  { %519 = vmatmul.mubr.msk.bf16.vlgmr.msra.gmra.mrb[0].mxu1 %vm179_vm3, %v148_v26 }
 0x108   :  { %542 = vmatprep.mubr.msk.bf16.mxu1 %vm605_vm1, %v604_v3  ;;  %535 = vmatpush3.bf16.msra.mxu1 %v564_v28 }
 0x109   :  { %536 = vmatprep.subr.bf16.mxu1 %v604_v3 }
 0x10c   :  { %537 = vmatpush3.bf16.msra.mxu1 %v566_v30 }
 0x10d   :  { %538 = vmatprep.subr.bf16.mxu1 %v604_v3 }
 0x110   :  { %539 = vmatpush3.bf16.msra.mxu1 %v568_v32 }
 0x111   :  { %540 = vmatprep.subr.bf16.mxu1 %v604_v3 }
 0x114   :  { %541 = vmatpush3.bf16.msra.mxu1 %v570_v34 }
 0x1da   :  { %v217_v36 = vpop.f32.mrb[0].mxu1 }
 0x1db   :  { %v218_v37 = vadd.f32 %v466_v35, %v217_v36  ;;  %v520_v38 = vpop.f32.mrb[1].mxu1 }
 0x1dc   :  { %v220_v39 = vpop.f32.mrb[2].mxu1 }
 0x1dd   :  { %v221_v40 = vadd.f32 %v466_v35, %v220_v39  ;;  %v521_v41 = vpop.f32.mrb[3].mxu1  ;;  %575 = vtanh.f32 %v218_v37 }
 0x1df   :  { %577 = vtanh.f32 %v221_v40 }
 0x1e7   :  { %v576_v42 = vpop.eup %575 }
 0x1e9   :  { %v578_v43 = vpop.eup %577 }
 0x1ea   :  { %v244_v44 = vpack.c.bf16 %v578_v43, %v576_v42 }
 0x1ec   :  { %531 = vmatmul.mubr.msk.bf16.vlgmr.msra.gmra.mrb[4].mxu0 %vm179_vm3, %v244_v44  ;;  %v325_v45 = vrot.slane %v244_v44, 4 }
 0x1ed   :  { %548 = vmatprep.mubr.msk.bf16.mxu0 %vm605_vm1, %v604_v3 }
 0x1ee   :  { %543 = vmatmul.mubr.msk.bf16.vlgmr.msra.gmra.mrb[4].mxu1 %vm179_vm3, %v325_v45 }
 0x2bf   :  { %v312_v46 = vpop.f32.mrb[4].mxu0 }
 0x2c0   :  { %v532_v48 = vpop.f32.mrb[5].mxu0  ;;  %v313_v60 = vadd.f32 %v472_v58, %v312_v46 }
 0x2c1   :  { %v315_v49 = vpop.f32.mrb[6].mxu0  ;;  %v387_v50 = vpop.f32.mrb[4].mxu1 }
 0x2c2   :  { %v388_v51 = vadd.f32 %v478_v47, %v387_v50  ;;  %v533_v52 = vpop.f32.mrb[7].mxu0  ;;  %v544_v53 = vpop.f32.mrb[5].mxu1  ;;  %v394_v61 = vpack.c.bf16 %v313_v60, %v313_v60 }
 0x2c3   :  { %v390_v54 = vpop.f32.mrb[6].mxu1 }
 0x2c4   :  { %v393_v55 = vmax.f32 %v388_v51, 0.0  ;;  %v545_v56 = vpop.f32.mrb[7].mxu1 }
 0x2c6   :  { %v395_v57 = vpack.c.bf16 %v393_v55, %v393_v55 }
 0x2c8   :  { %v402_v59 = vsel %vm67_vm0, %v395_v57, 0 }
 0x2c9   :  { %547 = vmatpush3.bf16.xpose.msra.mxu0 %v402_v59 }
 0x2d0   :  { %549 = vmatmul.mubr.msk.bf16.vlgmr.msra.gmra.mrb[8].mxu0 %vm67_vm0, %v394_v61 }
 0x3a3   :  { %v438_v63 = vpop.f32.mrb[8].mxu0 }
 0x3a4   :  { %v439_v0 = vadd.f32 %v438_v63, %v397_v62  ;;  %v550_v1 = vpop.f32.mrb[9].mxu0 }
 0x3a5   :  { %v441_v2 = vpop.f32.mrb[10].mxu0 }
 0x3a6   :  { %v551_v3 = vpop.f32.mrb[11].mxu0  ;;  %v445_v4 = vsel %vm444_vm4, %v439_v0, 0.0 }
 0x3a7   :  { %446 = vst [vmem:[#allocation3] sm:$0xff] %v445_v4 }
 0x3a8   :  { %590 = shalt.err (!%p587_p4)
}
 0x3a9   :  { %s591_s5 = scalar_lea.hbm %s799_s13, 128 }
 0x3aa   :  { %p592_p5 = scmp.ne.s32.totalorder %s799_s13, %s591_s5  ;;  %p595_p6 = scmp.lt.u32.totalorder %s591_s5, %s799_s13 }
 0x3ac   :  { %p597_p7 = pnand %p595_p6, %p592_p5 }
 0x3ae   :  { %600 = shalt.err (!%p597_p7)
}
 0x3af   :  { %456 = dma.vmem_to_hbm [thread:$0]  %s454_s23, 128, %s799_s13, [#allocation4]  }
 0x3b0   :  { %601 = dma.done.wait [#allocation4], 128  }
 0x3b1   :  { %602 = vsyncadd [#allocation4], 4294967168 }
 0x3b2   :  { %460 = vsyncpa [#allocation4], 1 }

</bundles_post_ra>
